<compile_context>
chip_gen: v6e
topology: v6e:2x2x1
jax: 0.10.0
libtpu: 0.0.40
codegen_flags: <defaults>
</compile_context>

<pallas_src>
import math

import numpy as np
import jax
import jax.numpy as jnp
from jax.experimental import pallas as pl
from jax.experimental.pallas import tpu as pltpu

OUT_H, OUT_W = 12, 52
OUT_HW = OUT_H * OUT_W  # 624


def _cdiv(a, b):
    return -(-a // b)


# ---------------------------------------------------------------------------
# Bicubic interpolation weights (align_corners=True, a=-0.75), matching
# torch.nn.functional.interpolate(mode='bicubic', align_corners=True).
# Pure numpy at trace time -> compile-time constants, nothing built on-device.
# ---------------------------------------------------------------------------
def _cubic_np(d, a=-0.75):
    d = np.abs(d)
    near = ((a + 2.0) * d - (a + 3.0)) * d * d + 1.0
    far = (((d - 5.0) * d + 8.0) * d - 4.0) * a
    return np.where(d <= 1.0, near, np.where(d < 2.0, far, 0.0))


def _bicubic_weights_np(out_size, in_size):
    """Dense (out_size, in_size) interpolation matrix with border-clamped taps."""
    scale = 0.0 if out_size == 1 else (in_size - 1) / (out_size - 1)
    j = np.arange(out_size)
    s = j * scale
    i0 = np.floor(s).astype(np.int64)
    t = s - i0
    w = np.zeros((out_size, in_size), dtype=np.float64)
    for k in range(4):                                # taps at i0-1 .. i0+2
        wk = _cubic_np(t - (k - 1))
        idx = np.clip(i0 + (k - 1), 0, in_size - 1)
        np.add.at(w, (j, idx), wk)                    # clamped taps collide -> accumulate
    return w.astype(np.float32)                       # exact identity when in == out


# ---------------------------------------------------------------------------
# Per-generation hardware knobs (v5e / v6e / v7x).
# ---------------------------------------------------------------------------
def _device_kind():
    try:
        return jax.devices()[0].device_kind.lower().replace(" ", "")
    except Exception:
        return ""


def _tpu_gen():
    kind = _device_kind()
    for g in (7, 6, 5, 4, 3, 2):
        if f"v{g}" in kind or f"tpu{g}" in kind:
            return g
    return 0


def _num_tensorcores():
    """TensorCores a single Pallas program can shard a 'parallel' grid across."""
    kind = _device_kind()
    if "v7" in kind or "tpu7" in kind:
        return 2                                     # v7x: 2 TCs per chip
    if "v4" in kind:
        return 2                                     # v4 megacore
    if "v5" in kind and "lite" not in kind and "v5e" not in kind:
        return 2                                     # v5p megacore
    return 1                                         # v5e / v6e: single TensorCore


def _vmem_params(gen):
    """Scoped-VMEM default / safe cap / input double-buffer budget per generation."""
    if gen >= 7:   # v7x: only 64 MiB physical VMEM per TC -> conservative cap
        return {"default": 32 << 20, "cap": 42 << 20, "in_budget": 12 << 20}
    if gen == 6:   # v6e: 128 MiB physical, 32 MiB default scoped -> bigger blocks
        return {"default": 32 << 20, "cap": 56 << 20, "in_budget": 24 << 20}
    if gen == 5:   # v5e/v5p: 128 MiB physical, 16 MiB default scoped
        return {"default": 16 << 20, "cap": 56 << 20, "in_budget": 8 << 20}
    return {"default": 16 << 20, "cap": 40 << 20, "in_budget": 8 << 20}


def _maybe_vmem_limit(cp_kwargs, vmem_est, vp):
    # Set the limit whenever the (intermediate-inclusive) estimate gets anywhere
    # near the default scoped VMEM (e.g. >10 MiB of v5e's 16 MiB default).
    if vmem_est > (vp["default"] * 5) // 8:
        cp_kwargs["vmem_limit_bytes"] = int(min(vmem_est + (2 << 20), vp["cap"]))
    return cp_kwargs


def _pick_tn(n, row_bytes, budget_bytes, multiple, cores):
    """Rows/planes per grid step.

    TN is either a multiple of `multiple` (sublane-tiling constraint on the
    block's second-to-last dim) or equal to `n` (full-dim blocks are always
    legal).  Blocks fit `budget_bytes` double-buffered.  On multi-TensorCore
    chips we prefer >=2 blocks of *real* work; we never pad with zero planes.
    """
    if n <= 0:
        return 1, 1
    fits_whole = 2 * n * row_bytes <= budget_bytes
    want_split = cores >= 2 and n >= 2
    if fits_whole and not want_split:
        return n, 1
    cap = max(1, budget_bytes // max(1, 2 * row_bytes))
    target = _cdiv(n, cores) if want_split else n
    tn = (min(cap, target) // multiple) * multiple
    tn = max(multiple, tn)
    if tn >= n:
        return n, 1
    return tn, _cdiv(n, tn)


# ---------------------------------------------------------------------------
# Kernels
# ---------------------------------------------------------------------------
def _relu_kernel(x_ref, o_ref):
    o_ref[...] = jnp.maximum(x_ref[...], 0.0).astype(o_ref.dtype)


def _kron_resize_relu_kernel(x_ref, w_ref, o_ref):
    # relu( x(TN, H*W) @ W_kron(H*W, 624) ): one matmul, lane-dense single store.
    y = jnp.dot(x_ref[...], w_ref[...], preferred_element_type=jnp.float32)
    o_ref[...] = jnp.maximum(y, 0.0).astype(o_ref.dtype)


def _sep_resize_relu_kernel(x_ref, wwt_ref, whbd_ref, o_ref):
    # Column pass, planes folded into the MXU M dim: (TN*H, W) @ (W, 52).
    t = jnp.dot(x_ref[...], wwt_ref[...], preferred_element_type=jnp.float32)
    # Row pass for ALL TN planes in one matmul via a block-diagonal weight:
    # (TN*12, TN*H) @ (TN*H, 52) -> (TN*12, 52); fused ReLU, single store.
    y = jnp.dot(whbd_ref[...], t, preferred_element_type=jnp.float32)
    o_ref[...] = jnp.maximum(y, 0.0).astype(o_ref.dtype)


# ---------------------------------------------------------------------------
# Wrappers
# ---------------------------------------------------------------------------
def _relu_identity_path(x):
    """(H, W) == (12, 52): every resize is an exact no-op -> module is just ReLU."""
    B, C, H, W = x.shape
    N = B * C
    cols = H * W                                     # 624-wide lane-dense rows
    itemsize = np.dtype(x.dtype).itemsize
    x2 = x.reshape(N, cols)                          # free in row-major (no pad/slice)

    TN, grid_n = _pick_tn(N, cols * itemsize, 8 << 20, 8, _num_tensorcores())
    y = pl.pallas_call(
        _relu_kernel,
        out_shape=jax.ShapeDtypeStruct((N, cols), x.dtype),
        grid=(grid_n,),
        in_specs=[pl.BlockSpec((TN, cols), lambda i: (i, 0))],
        out_specs=pl.BlockSpec((TN, cols), lambda i: (i, 0)),
        compiler_params=pltpu.CompilerParams(dimension_semantics=("parallel",)),
    )(x2)
    return y.reshape(B, C, H, W)


def _resize_relu_kron(x):
    """Small planes: fused relu(x_flat @ (wh ⊗ ww)^T) with a lane-dense 624 output."""
    B, C, H, W = x.shape
    N, HW = B * C, H * W
    dtype = x.dtype
    itemsize = np.dtype(dtype).itemsize
    cores = _num_tensorcores()
    vp = _vmem_params(_tpu_gen())
    w_dtype = dtype if itemsize < 4 else jnp.float32   # bf16 in -> bf16 weights (MXU native)
    w_item = itemsize if itemsize < 4 else 4

    # (H*W, 624) fused weight: Wk[h*W+w, i*52+j] = wh[i,h] * ww[j,w].
    wk = np.kron(_bicubic_weights_np(OUT_H, H), _bicubic_weights_np(OUT_W, W)).T
    wk = jnp.asarray(np.ascontiguousarray(wk), dtype=w_dtype)

    x2 = x.reshape(N, HW)                              # free
    TN, grid_n = _pick_tn(N, HW * itemsize, min(vp["in_budget"], 8 << 20), 8, cores)

    vmem_est = (2 * TN * HW * itemsize                 # double-buffered input blocks
                + 2 * HW * OUT_HW * w_item             # fused weight (conservatively x2)
                + 2 * TN * OUT_HW * itemsize           # output blocks
                + TN * OUT_HW * 4                      # f32 matmul result before cast
                + (2 << 20))                           # relayout / internal scratch slack
    cp = _maybe_vmem_limit(dict(dimension_semantics=("parallel",)), vmem_est, vp)

    y = pl.pallas_call(
        _kron_resize_relu_kernel,
        out_shape=jax.ShapeDtypeStruct((N, OUT_HW), dtype),
        grid=(grid_n,),
        in_specs=[pl.BlockSpec((TN, HW), lambda i: (i, 0)),
                  pl.BlockSpec((HW, OUT_HW), lambda i: (0, 0))],
        out_specs=pl.BlockSpec((TN, OUT_HW), lambda i: (i, 0)),
        compiler_params=pltpu.CompilerParams(**cp),
    )(x2, wk)
    return y.reshape(B, C, OUT_H, OUT_W)


def _resize_relu_separable(x):
    """Large planes: separable bicubic.  Column pass folds planes into the matmul
    rows; the row pass is one block-diagonal matmul over all TN planes."""
    B, C, H, W = x.shape
    N = B * C
    dtype = x.dtype
    itemsize = np.dtype(dtype).itemsize
    cores = _num_tensorcores()
    vp = _vmem_params(_tpu_gen())
    w_dtype = dtype if itemsize < 4 else jnp.float32
    w_item = itemsize if itemsize < 4 else 4

    # When tiled, TN must make both TN*H (input rows) and TN*12 (output rows)
    # multiples of 8; a full-dim block (TN == N) is always legal.
    r = 8 // math.gcd(H, 8)
    multiple = max(r, 2)
    # TODO(synk): planes so large that even `multiple` of them exceed the VMEM cap
    # would additionally need W-tiling of the column pass inside the kernel.
    TN, grid_n = _pick_tn(N, H * W * itemsize, vp["in_budget"], multiple, cores)

    wh = _bicubic_weights_np(OUT_H, H)                 # (12, H)
    ww = _bicubic_weights_np(OUT_W, W)                 # (52, W)
    wwt = jnp.asarray(np.ascontiguousarray(ww.T), dtype=w_dtype)      # (W, 52)
    whbd = jnp.asarray(np.kron(np.eye(TN, dtype=np.float32), wh))     # (TN*12, TN*H) f32

    x2d = x.reshape(N * H, W)                          # free: planes folded into rows

    vmem_est = (2 * TN * H * W * itemsize              # double-buffered input blocks
                + 2 * W * OUT_W * w_item               # column weights
                + 2 * TN * OUT_H * TN * H * 4          # block-diagonal row weights
                + TN * H * OUT_W * 4                   # f32 intermediate t
                + 2 * TN * OUT_HW * itemsize           # output blocks
                + (2 << 20))                           # relayout / internal scratch slack
    cp = _maybe_vmem_limit(dict(dimension_semantics=("parallel",)), vmem_est, vp)

    out = pl.pallas_call(
        _sep_resize_relu_kernel,
        out_shape=jax.ShapeDtypeStruct((N * OUT_H, OUT_W), dtype),
        grid=(grid_n,),
        in_specs=[pl.BlockSpec((TN * H, W), lambda i: (i, 0)),         # TN planes, 2D slab
                  pl.BlockSpec((W, OUT_W), lambda i: (0, 0)),          # column weights
                  pl.BlockSpec((TN * OUT_H, TN * H), lambda i: (0, 0))],  # block-diag rows
        out_specs=pl.BlockSpec((TN * OUT_H, OUT_W), lambda i: (i, 0)),
        compiler_params=pltpu.CompilerParams(**cp),
    )(x2d, wwt, whbd)
    return out.reshape(B, C, OUT_H, OUT_W)


def model_forward(x):
    """x: (B, C, H, W) floating NCHW. Returns (B, C, 12, 52) == Model.forward(x)."""
    assert x.ndim == 4, "expected NCHW input"
    _, _, H, W = x.shape
    if (H, W) == (OUT_H, OUT_W):
        return _relu_identity_path(x)                  # all resizes are exact no-ops
    if H * W * OUT_HW * 4 <= (6 << 20):                # fused Kronecker weight <= 6 MiB
        return _resize_relu_kron(x)
    return _resize_relu_separable(x)


# ---------------------------------------------------------------------------
# Self-test
# ---------------------------------------------------------------------------
def _reference(x):
    B, C, H, W = x.shape
    wh = _bicubic_weights_np(OUT_H, H).astype(np.float64)
    ww = _bicubic_weights_np(OUT_W, W).astype(np.float64)
    xr = np.asarray(x, dtype=np.float64).reshape(B * C, H, W)
    ref = np.einsum('ih,nhw,jw->nij', wh, xr, ww)
    return jnp.asarray(np.maximum(ref, 0.0).reshape(B, C, OUT_H, OUT_W), dtype=x.dtype)


if __name__ == "__main__":
    key = jax.random.PRNGKey(0)
    k1, k2, k3 = jax.random.split(key, 3)

    # Case 1: original pnnx test shape (already 12x52) -> identity fast path (ReLU only).
    x1 = jax.random.normal(k1, (1, 3, 12, 52), dtype=jnp.float32)
    y1 = jax.block_until_ready(model_forward(x1))
    assert y1.shape == (1, 3, 12, 52)
    assert jnp.allclose(y1, jnp.maximum(x1, 0.0)), "identity path mismatch"

    # Case 2: general input -> fused Kronecker bicubic-resize + ReLU kernel.
    x2 = jax.random.normal(k2, (2, 4, 20, 30), dtype=jnp.float32)
    y2 = jax.block_until_ready(model_forward(x2))
    assert y2.shape == (2, 4, 12, 52)
    assert jnp.allclose(y2, _reference(x2), atol=2e-2, rtol=2e-2), "kron path mismatch"

    # Case 3: exercise the large-plane separable fallback kernel on a small shape.
    x3 = jax.random.normal(k3, (2, 2, 17, 24), dtype=jnp.float32)
    y3 = jax.block_until_ready(_resize_relu_separable(x3))
    assert y3.shape == (2, 2, 12, 52)
    assert jnp.allclose(y3, _reference(x3), atol=2e-2, rtol=2e-2), "separable path mismatch"

    print("KERNEL_OK")
</pallas_src>

<mosaic_0001>
module attributes {stable_mosaic.version = 11 : i64} {
  func.func @_relu_kernel(%arg0: i32, %arg1: memref<3x624xf32, #tpu.memory_space<vmem>>, %arg2: memref<3x624xf32, #tpu.memory_space<vmem>>) attributes {dimension_semantics = [#tpu.dimension_semantics<parallel>], iteration_bounds = array<i64: 1>, scalar_prefetch = 0 : i64, scratch_operands = 0 : i64, tpu.core_type = #tpu.core_type<tc>, window_params = [{transform_indices = @transform_0, window_bounds = array<i64: 3, 624>}, {transform_indices = @transform_1, window_bounds = array<i64: 3, 624>}]} {
    %c0 = arith.constant 0 : index
    %c0_0 = arith.constant 0 : index
    %0 = vector.load %arg1[%c0, %c0_0] : memref<3x624xf32, #tpu.memory_space<vmem>>, vector<3x624xf32>
    %cst = arith.constant 0.000000e+00 : f32
    %1 = vector.broadcast %cst : f32 to vector<3x624xf32>
    %2 = arith.maximumf %0, %1 : vector<3x624xf32>
    %c0_1 = arith.constant 0 : index
    %c0_2 = arith.constant 0 : index
    %3 = vector.load %arg2[%c0_1, %c0_2] : memref<3x624xf32, #tpu.memory_space<vmem>>, vector<3x624xf32>
    tpu.vector_store %arg2[%c0_1, %c0_2], %2 {strides = array<i32>} : memref<3x624xf32, #tpu.memory_space<vmem>>, vector<3x624xf32>,
    return
  }
  func.func @transform_0(%arg0: i32) -> (i32, i32) {
    %c0_i32 = arith.constant 0 : i32
    %c0_i32_0 = arith.constant 0 : i32
    return %arg0, %c0_i32 : i32, i32
  }
  func.func @transform_1(%arg0: i32) -> (i32, i32) {
    %c0_i32 = arith.constant 0 : i32
    %c0_i32_0 = arith.constant 0 : i32
    return %arg0, %c0_i32 : i32, i32
  }
}

</mosaic_0001>

<bundles_post_ra>
// kernel: tpu_custom_call.1
= control target key start
LH: loop header
LB: loop body
LE: loop exit
PB: predicated region body
PF: predicated region fallthrough
CT: control target
= control target key end

     0   :  { %6 = vsyncpa [#allocation3], 0  ;;  %s110_s0 = inlined_call_operand.hbm [shape: f32[3,624], index: 0, kind: input, shape index: {}]   ;;  %s111_s1 = inlined_call_operand.hbm [shape: f32[3,624], index: 1, kind: output, shape index: {}]  }
   0x1   :  { %7 = vsyncpa [#allocation4], 0  ;;  %s92_s6 = smov [#allocation2]  }
   0x2   :  { %s14_s7 = sshll.u32 %s92_s6, 4  ;;  %s15_s7 = int_to_ptr.vmem [resolvable:$true] %s14_s7 }
   0x3   :  { %s56_s8 = scalar_lea.vmem %s15_s7, 320  ;;  %p61_p1 = scmp.lt.s32.totalorder %s15_s7, %s15_s7 }
   0x4   :  { %p57_p0 = scmp.ne.s32.totalorder %s15_s7, %s56_s8  ;;  %p62_p2 = scmp.lt.s32.totalorder %s56_s8, %s56_s8 }
   0x6   :  { %p63_p3 = por %p62_p2, %p61_p1 }
   0x8   :  { %p64_p4 = pnand %p63_p3, %p57_p0 }
   0xa   :  { %67 = shalt.err (!%p64_p4)
}
   0xb   :  { %17 = dma.hbm_to_vmem [thread:$0]  %s110_s0, 320, %s15_s7, [#allocation3]  }
   0xc   :  { %88 = dma.done.wait [#allocation3], 320  }
   0xd   :  { %89 = vsyncadd [#allocation3], 4294966976  ;;  %s93_s11 = smov [#allocation5]   ;;  %vm29_vm0 = vcmask 911360   ;;  %v21_v0 = vld [vmem:[#allocation2] sm:$0x77] }
   0xe   :  { %s37_s12 = sshll.u32 %s93_s11, 4  ;;  %v22_v1 = vld [vmem:[#allocation2 + $0x8] sm:$0x77]  ;;  %v23_v2 = vld [vmem:[#allocation2 + $0x10] sm:$0x7]  ;;  %v24_v3 = vmax.f32 %v21_v0, 0.0  ;;  %s38_s12 = int_to_ptr.vmem [resolvable:$true] %s37_s12 }
   0xf   :  { %v25_v4 = vmax.f32 %v22_v1, 0.0  ;;  %v26_v5 = vmax.f32 %v23_v2, 0.0  ;;  %s68_s13 = scalar_lea.vmem %s38_s12, 320  ;;  %p73_p6 = scmp.lt.s32.totalorder %s38_s12, %s38_s12 }
  0x10   :  { %27 = vst [vmem:[#allocation5] sm:$0x77] %v24_v3  ;;  %p69_p5 = scmp.ne.s32.totalorder %s38_s12, %s68_s13  ;;  %p74_p7 = scmp.lt.s32.totalorder %s68_s13, %s68_s13 }
  0x11   :  { %28 = vst [vmem:[#allocation5 + $0x8] sm:$0x77] %v25_v4  ;;  %30 = vst.msk [vmem:[#allocation5 + $0x10] sm:$0x7] %vm29_vm0, %v26_v5 }
  0x12   :  { %p75_p8 = por %p74_p7, %p73_p6 }
  0x14   :  { %p76_p9 = pnand %p75_p8, %p69_p5 }
  0x16   :  { %79 = shalt.err (!%p76_p9)
}
  0x17   :  { %40 = dma.vmem_to_hbm [thread:$0]  %s38_s12, 320, %s111_s1, [#allocation4]  }
  0x18   :  { %90 = dma.done.wait [#allocation4], 320  }
  0x19   :  { %91 = vsyncadd [#allocation4], 4294966976 }
  0x1a   :  { %44 = vsyncpa [#allocation3], 1 }
  0x1b   :  { %45 = vsyncpa [#allocation4], 1 }

</bundles_post_ra>
